<compile_context>
chip_gen: v7x
topology: tpu7x:2x2x1
jax: 0.10.0
libtpu: 0.0.40
codegen_flags: <defaults>
</compile_context>

<pallas_src>
import jax
import jax.numpy as jnp
from jax.experimental import pallas as pl
from jax.experimental.pallas import tpu as pltpu


def _transition_kernel(scales_ref, x_ref, w_ref, a_ref, b_ref, p_ref, o_ref):
    """One (batch, H-tile) grid step.

    scales_ref : SMEM f32[3] = [1/s_x, s_bn*w_scale/s_conv, s_conv]
    x_ref      : VMEM f32[1, cin, S]     raw NCHW activations, S = th*w (lanes)
    w_ref      : VMEM bf16[cout, cin]    symmetric int8 weight codes
    a_ref,b_ref: VMEM f32[cin, 1]        fused quant+BN+ReLU+requant affine
    p_ref      : VMEM bf16[S, S//4]      0/1 pool-window matrix
    o_ref      : VMEM f32[1, cout, S//4] dequantized output (channel-major)
    """
    inv_s_x = scales_ref[0]
    s_combo = scales_ref[1]
    s_conv = scales_ref[2]

    x = x_ref[0]                                              # (cin, S), lane-dense

    # 1) per-tensor input quantization (quint8, zp=64), kept zero-centered.
    qm = jnp.clip(jnp.round(x * inv_s_x), -64.0, 191.0)       # q - 64

    # 2) dequant + BN + ReLU + requant folded into one per-channel affine.
    #    ReLU is subsumed by the clip lower bound 0 (s_bn > 0).
    yq = jnp.clip(jnp.round(qm * a_ref[...] + b_ref[...]), 0.0, 255.0)

    # 3) 1x1 conv == channel matmul on INTEGER codes.  Codes (0..255 / +-127)
    #    are exact in bf16 and sums are exact in f32 for cin <= ~518, so the
    #    bf16 MXU path is bit-equivalent to f32 here.
    zi = jnp.dot(w_ref[...], yq.astype(jnp.bfloat16),
                 preferred_element_type=jnp.float32)          # (cout, S)
    cz = jnp.clip(jnp.round(zi * s_combo), -64.0, 191.0)      # zq - 64 (centered)

    # 4) avg_pool2d(2) in the quantized domain via a 0/1 pooling matmul: keeps
    #    the channel-major layout lane-dense, avoids strided reads and
    #    lane-splitting reshapes entirely; sums of <=4 codes are exact.
    acc = jnp.dot(cz.astype(jnp.bfloat16), p_ref[...],
                  preferred_element_type=jnp.float32)         # (cout, S/4)
    pq = jnp.clip(jnp.round(0.25 * acc), -64.0, 191.0)        # pooled code - 64

    # 5) dequantize (is_transition=True); channel-major, lane-dense store.
    o_ref[0] = pq * s_conv


def _pool_matrix(th, w):
    """0/1 matrix mapping a flattened (th, w) tile to its 2x2-pooled (th/2, w/2)."""
    th2, w2 = th // 2, w // 2
    s = jnp.arange(th * w)
    pooled = (s // w // 2) * w2 + (s % w) // 2
    return (pooled[:, None] == jnp.arange(th2 * w2)[None, :]).astype(jnp.bfloat16)


def _pick_tile_h(h, w, cin, cout, budget_bytes=12 << 20):
    """Largest even divisor of h whose working set fits a modest VMEM budget.

    Budget is kept well under the 32 MiB scoped default (and v7x's 64 MiB
    physical VMEM): 2x double-buffered input + 2x output + pool matrix + weights.
    """
    best = 0
    for th in range(2, h + 1, 2):
        if h % th:
            continue
        if th != h and ((th * w) % 128 or ((th // 2) * (w // 2)) % 128):
            continue  # BlockSpec lane alignment when not covering full H
        s, s4 = th * w, (th * w) // 4
        need = 2 * cin * s * 4 + 2 * cout * s4 * 4 + s * s4 * 2 + cout * cin * 2
        if need <= budget_bytes:
            best = th
    return best if best else h


def qfw_transition_forward(x_nchw, gamma, beta, run_mean, run_var,
                           conv_w, bn_op_scale, conv_op_scale, input_scale,
                           eps=1e-5, tile_h=None):
    """x_nchw: (N, Cin, H, W) float32.  Returns (N, Cout, H/2, W/2) float32."""
    n, cin, h, w = x_nchw.shape
    cout = conv_w.shape[0]
    assert h % 2 == 0 and w % 2 == 0

    th = _pick_tile_h(h, w, cin, cout) if tile_h is None else tile_h
    assert th % 2 == 0 and h % th == 0
    assert th == h or (th * w) % 128 == 0
    th2, w2 = th // 2, w // 2
    h2 = h // 2
    assert th == h or (th2 * w2) % 128 == 0

    # No NCHW->NHWC transpose and no extra abs-max pass over x: the kernel
    # consumes NCHW through a metadata-only reshape (channel-major compute).
    x_flat = x_nchw.reshape(n, cin, h * w)

    s_x = jnp.asarray(input_scale, jnp.float32)
    s_bn = jnp.asarray(bn_op_scale, jnp.float32)
    s_conv = jnp.asarray(conv_op_scale, jnp.float32)

    # BN folded into per-channel scale / shift, then fused with the input
    # dequant (x s_x) and the BN-output requant (/ s_bn) into one affine that
    # acts directly on the zero-centered input codes.
    inv_std = 1.0 / jnp.sqrt(run_var.astype(jnp.float32) + eps)
    a_bn = gamma.astype(jnp.float32) * inv_std
    b_bn = beta.astype(jnp.float32) - run_mean.astype(jnp.float32) * a_bn
    a2 = (s_x * a_bn / s_bn).reshape(cin, 1).astype(jnp.float32)
    b2 = (b_bn / s_bn).reshape(cin, 1).astype(jnp.float32)

    # Symmetric int8 weight codes travel as bf16 (exact for |code| <= 127);
    # the weight scale is folded into the single post-matmul requant scalar.
    w2d = conv_w[:, :, 0, 0].astype(jnp.float32)                       # (Cout, Cin)
    w_scale = jnp.maximum(jnp.max(jnp.abs(w2d)), 1e-8) / 127.0
    w_codes = jnp.clip(jnp.round(w2d / w_scale), -127.0, 127.0).astype(jnp.bfloat16)

    scales = jnp.stack([1.0 / s_x, s_bn * w_scale / s_conv, s_conv]).astype(jnp.float32)
    pool_mat = _pool_matrix(th, w)                                      # (th*w, th2*w2)

    out_flat = pl.pallas_call(
        _transition_kernel,
        out_shape=jax.ShapeDtypeStruct((n, cout, h2 * w2), jnp.float32),
        grid=(n, h // th),                                   # batch x H-tiles
        in_specs=[
            pl.BlockSpec(memory_space=pltpu.MemorySpace.SMEM),            # scales
            pl.BlockSpec((1, cin, th * w), lambda i, j: (i, 0, j)),       # x (NCHW)
            pl.BlockSpec((cout, cin), lambda i, j: (0, 0)),               # weight codes
            pl.BlockSpec((cin, 1), lambda i, j: (0, 0)),                  # fused scale
            pl.BlockSpec((cin, 1), lambda i, j: (0, 0)),                  # fused shift
            pl.BlockSpec((th * w, th2 * w2), lambda i, j: (0, 0)),        # pool matrix
        ],
        # channel-major, lane-dense output slab: (N, Cout, H2*W2)
        out_specs=pl.BlockSpec((1, cout, th2 * w2), lambda i, j: (i, 0, j)),
        compiler_params=pltpu.CompilerParams(
            # Batch axis stays parallel so v7x's 2 TensorCores both get work
            # even when one H-tile covers the whole image.
            dimension_semantics=("parallel", "parallel"),
            vmem_limit_bytes=32 << 20,
        ),
    )(scales, x_flat, w_codes, a2, b2, pool_mat)

    # (N, Cout, H2*W2) -> NCHW is a pure reshape: no output HBM transpose.
    return out_flat.reshape(n, cout, h2, w // 2)


def _reference_forward(x, gamma, beta, run_mean, run_var, conv_w,
                       s_bn, s_conv, s_x, eps=1e-5):
    """Plain-JAX reference of the simulated quantized forward (unfused math)."""
    n, cin, h, w = x.shape
    cout = conv_w.shape[0]
    q = jnp.clip(jnp.round(x / s_x) + 64.0, 0.0, 255.0)
    xd = (q - 64.0) * s_x
    inv_std = 1.0 / jnp.sqrt(run_var + eps)
    a = (gamma * inv_std).reshape(1, cin, 1, 1)
    b = (beta - run_mean * gamma * inv_std).reshape(1, cin, 1, 1)
    y = jnp.maximum(xd * a + b, 0.0)
    yq = jnp.clip(jnp.round(y / s_bn), 0.0, 255.0)
    w2d = conv_w[:, :, 0, 0]
    w_scale = jnp.maximum(jnp.max(jnp.abs(w2d)), 1e-8) / 127.0
    w_codes = jnp.clip(jnp.round(w2d / w_scale), -127.0, 127.0)
    zi = jnp.einsum('nchw,oc->nohw', yq, w_codes)
    zq = jnp.clip(jnp.round(zi * (s_bn * w_scale / s_conv)) + 64.0, 0.0, 255.0)
    zq = zq.reshape(n, cout, h // 2, 2, w // 2, 2)
    pq = jnp.clip(jnp.round(zq.mean(axis=(3, 5))), 0.0, 255.0)
    return (pq - 64.0) * s_conv


if __name__ == "__main__":
    # small shapes consistent with a DenseNet transition (out_planes = in_planes // 2)
    N, CIN, COUT, H, W = 2, 16, 8, 32, 32

    key = jax.random.PRNGKey(0)
    kx, kw, kg, kb, km, kv = jax.random.split(key, 6)

    x = jax.random.normal(kx, (N, CIN, H, W), dtype=jnp.float32)

    # deterministic synthetic parameters (no checkpoint load)
    gamma = 1.0 + 0.1 * jax.random.normal(kg, (CIN,), dtype=jnp.float32)
    beta = 0.05 * jax.random.normal(kb, (CIN,), dtype=jnp.float32)
    run_mean = 0.1 * jax.random.normal(km, (CIN,), dtype=jnp.float32)
    run_var = 1.0 + 0.1 * jax.nn.softplus(jax.random.normal(kv, (CIN,), dtype=jnp.float32))
    conv_w = 0.2 * jax.random.normal(kw, (COUT, CIN, 1, 1), dtype=jnp.float32)

    # synthetic calibrated op_scales (deterministic constants)
    bn_op_scale = jnp.float32(0.04)
    conv_op_scale = jnp.float32(0.05)

    # one-off calibration of the input scale (analogue of tensor_scale(x)),
    # done outside the hot wrapper so the kernel path never re-reads x for it.
    input_scale = jnp.maximum(jnp.max(jnp.abs(x)), 1e-8) / 127.0

    out = qfw_transition_forward(x, gamma, beta, run_mean, run_var, conv_w,
                                 bn_op_scale, conv_op_scale, input_scale)
    out = jax.block_until_ready(out)

    assert out.shape == (N, COUT, H // 2, W // 2), out.shape
    assert out.dtype == jnp.float32
    assert bool(jnp.all(jnp.isfinite(out)))

    ref = _reference_forward(x, gamma, beta, run_mean, run_var, conv_w,
                             bn_op_scale, conv_op_scale, input_scale)
    # tolerate <= ~3 quantization codes of drift from fused-vs-unfused rounding
    assert float(jnp.max(jnp.abs(out - ref))) < 3.0 * float(conv_op_scale)

    print("KERNEL_OK")
</pallas_src>

<mosaic_0001>
module attributes {stable_mosaic.version = 11 : i64} {
  func.func @_transition_kernel(%arg0: i32, %arg1: i32, %arg2: memref<3xf32, #tpu.memory_space<smem>>, %arg3: memref<1x16x1024xf32, #tpu.memory_space<vmem>>, %arg4: memref<8x16xbf16, #tpu.memory_space<vmem>>, %arg5: memref<16x1xf32, #tpu.memory_space<vmem>>, %arg6: memref<16x1xf32, #tpu.memory_space<vmem>>, %arg7: memref<1024x256xbf16, #tpu.memory_space<vmem>>, %arg8: memref<1x8x256xf32, #tpu.memory_space<vmem>>) attributes {dimension_semantics = [#tpu.dimension_semantics<parallel>, #tpu.dimension_semantics<parallel>], iteration_bounds = array<i64: 2, 1>, scalar_prefetch = 0 : i64, scratch_operands = 0 : i64, tpu.core_type = #tpu.core_type<tc>, window_params = [{transform_indices = @transform_0, window_bounds = array<i64: 3>}, {transform_indices = @transform_1, window_bounds = array<i64: 1, 16, 1024>}, {pipeline_mode = #tpu.pipeline_mode<synchronous>, transform_indices = @transform_2, window_bounds = array<i64: 8, 16>}, {pipeline_mode = #tpu.pipeline_mode<synchronous>, transform_indices = @transform_3, window_bounds = array<i64: 16, 1>}, {pipeline_mode = #tpu.pipeline_mode<synchronous>, transform_indices = @transform_4, window_bounds = array<i64: 16, 1>}, {pipeline_mode = #tpu.pipeline_mode<synchronous>, transform_indices = @transform_5, window_bounds = array<i64: 1024, 256>}, {transform_indices = @transform_6, window_bounds = array<i64: 1, 8, 256>}]} {
    %c0 = arith.constant 0 : index
    %0 = memref.load %arg2[%c0] : memref<3xf32, #tpu.memory_space<smem>>
    %c1 = arith.constant 1 : index
    %1 = memref.load %arg2[%c1] : memref<3xf32, #tpu.memory_space<smem>>
    %c2 = arith.constant 2 : index
    %2 = memref.load %arg2[%c2] : memref<3xf32, #tpu.memory_space<smem>>
    %c0_0 = arith.constant 0 : index
    %c0_1 = arith.constant 0 : index
    %c0_2 = arith.constant 0 : index
    %3 = vector.load %arg3[%c0_0, %c0_1, %c0_2] : memref<1x16x1024xf32, #tpu.memory_space<vmem>>, vector<1x16x1024xf32>
    %4 = vector.shape_cast %3 : vector<1x16x1024xf32> to vector<16x1024xf32>
    %5 = vector.broadcast %0 : f32 to vector<16x1024xf32>
    %6 = arith.mulf %4, %5 : vector<16x1024xf32>
    %7 = math.roundeven %6 : vector<16x1024xf32>
    %cst = arith.constant -6.400000e+01 : f32
    %cst_3 = arith.constant 1.910000e+02 : f32
    %8 = vector.broadcast %cst : f32 to vector<16x1024xf32>
    %9 = arith.maximumf %8, %7 : vector<16x1024xf32>
    %10 = vector.broadcast %cst_3 : f32 to vector<16x1024xf32>
    %11 = arith.minimumf %10, %9 : vector<16x1024xf32>
    %c0_4 = arith.constant 0 : index
    %c0_5 = arith.constant 0 : index
    %12 = vector.load %arg5[%c0_4, %c0_5] : memref<16x1xf32, #tpu.memory_space<vmem>>, vector<16x1xf32>
    %13 = vector.broadcast %12 : vector<16x1xf32> to vector<16x1024xf32>
    %14 = arith.mulf %11, %13 : vector<16x1024xf32>
    %c0_6 = arith.constant 0 : index
    %c0_7 = arith.constant 0 : index
    %15 = vector.load %arg6[%c0_6, %c0_7] : memref<16x1xf32, #tpu.memory_space<vmem>>, vector<16x1xf32>
    %16 = vector.broadcast %15 : vector<16x1xf32> to vector<16x1024xf32>
    %17 = arith.addf %14, %16 : vector<16x1024xf32>
    %18 = math.roundeven %17 : vector<16x1024xf32>
    %cst_8 = arith.constant 0.000000e+00 : f32
    %cst_9 = arith.constant 2.550000e+02 : f32
    %19 = vector.broadcast %cst_8 : f32 to vector<16x1024xf32>
    %20 = arith.maximumf %19, %18 : vector<16x1024xf32>
    %21 = vector.broadcast %cst_9 : f32 to vector<16x1024xf32>
    %22 = arith.minimumf %21, %20 : vector<16x1024xf32>
    %c0_10 = arith.constant 0 : index
    %c0_11 = arith.constant 0 : index
    %23 = vector.load %arg4[%c0_10, %c0_11] : memref<8x16xbf16, #tpu.memory_space<vmem>>, vector<8x16xbf16>
    %24 = arith.truncf %22 : vector<16x1024xf32> to vector<16x1024xbf16>
    %cst_12 = arith.constant dense<0.000000e+00> : vector<8x1024xf32>
    %25 = tpu.matmul %23, %24, %cst_12 {dimension_numbers = #tpu.dot_dimension_numbers<[1], [0], [0], [1], [0, 0, 1, 1], [], []>} : vector<8x16xbf16>, vector<16x1024xbf16>, vector<8x1024xf32> -> vector<8x1024xf32>
    %26 = vector.broadcast %1 : f32 to vector<8x1024xf32>
    %27 = arith.mulf %25, %26 : vector<8x1024xf32>
    %28 = math.roundeven %27 : vector<8x1024xf32>
    %cst_13 = arith.constant -6.400000e+01 : f32
    %cst_14 = arith.constant 1.910000e+02 : f32
    %29 = vector.broadcast %cst_13 : f32 to vector<8x1024xf32>
    %30 = arith.maximumf %29, %28 : vector<8x1024xf32>
    %31 = vector.broadcast %cst_14 : f32 to vector<8x1024xf32>
    %32 = arith.minimumf %31, %30 : vector<8x1024xf32>
    %33 = arith.truncf %32 : vector<8x1024xf32> to vector<8x1024xbf16>
    %c0_15 = arith.constant 0 : index
    %c0_16 = arith.constant 0 : index
    %34 = vector.load %arg7[%c0_15, %c0_16] : memref<1024x256xbf16, #tpu.memory_space<vmem>>, vector<1024x256xbf16>
    %cst_17 = arith.constant dense<0.000000e+00> : vector<8x256xf32>
    %35 = tpu.matmul %33, %34, %cst_17 {dimension_numbers = #tpu.dot_dimension_numbers<[1], [0], [0], [1], [0, 0, 1, 1], [], []>} : vector<8x1024xbf16>, vector<1024x256xbf16>, vector<8x256xf32> -> vector<8x256xf32>
    %cst_18 = arith.constant 2.500000e-01 : f32
    %36 = vector.broadcast %cst_18 : f32 to vector<8x256xf32>
    %37 = arith.mulf %36, %35 : vector<8x256xf32>
    %38 = math.roundeven %37 : vector<8x256xf32>
    %cst_19 = arith.constant -6.400000e+01 : f32
    %cst_20 = arith.constant 1.910000e+02 : f32
    %39 = vector.broadcast %cst_19 : f32 to vector<8x256xf32>
    %40 = arith.maximumf %39, %38 : vector<8x256xf32>
    %41 = vector.broadcast %cst_20 : f32 to vector<8x256xf32>
    %42 = arith.minimumf %41, %40 : vector<8x256xf32>
    %43 = vector.broadcast %2 : f32 to vector<8x256xf32>
    %44 = arith.mulf %42, %43 : vector<8x256xf32>
    %c0_21 = arith.constant 0 : index
    %c0_22 = arith.constant 0 : index
    %c0_23 = arith.constant 0 : index
    %45 = vector.load %arg8[%c0_21, %c0_22, %c0_23] : memref<1x8x256xf32, #tpu.memory_space<vmem>>, vector<1x8x256xf32>
    %46 = vector.shape_cast %45 : vector<1x8x256xf32> to vector<8x256xf32>
    %47 = vector.shape_cast %44 : vector<8x256xf32> to vector<1x8x256xf32>
    tpu.vector_store %arg8[%c0_21, %c0_22, %c0_23], %47 {strides = array<i32>} : memref<1x8x256xf32, #tpu.memory_space<vmem>>, vector<1x8x256xf32>,
    return
  }
  func.func @transform_0(%arg0: i32, %arg1: i32) -> i32 {
    %c0_i32 = arith.constant 0 : i32
    %c0_i32_0 = arith.constant 0 : i32
    return %c0_i32 : i32
  }
  func.func @transform_1(%arg0: i32, %arg1: i32) -> (i32, i32, i32) {
    %c0_i32 = arith.constant 0 : i32
    %c0_i32_0 = arith.constant 0 : i32
    return %arg0, %c0_i32, %arg1 : i32, i32, i32
  }
  func.func @transform_2(%arg0: i32, %arg1: i32) -> (i32, i32) {
    %c0_i32 = arith.constant 0 : i32
    %c0_i32_0 = arith.constant 0 : i32
    %c0_i32_1 = arith.constant 0 : i32
    return %c0_i32, %c0_i32_0 : i32, i32
  }
  func.func @transform_3(%arg0: i32, %arg1: i32) -> (i32, i32) {
    %c0_i32 = arith.constant 0 : i32
    %c0_i32_0 = arith.constant 0 : i32
    %c0_i32_1 = arith.constant 0 : i32
    return %c0_i32, %c0_i32_0 : i32, i32
  }
  func.func @transform_4(%arg0: i32, %arg1: i32) -> (i32, i32) {
    %c0_i32 = arith.constant 0 : i32
    %c0_i32_0 = arith.constant 0 : i32
    %c0_i32_1 = arith.constant 0 : i32
    return %c0_i32, %c0_i32_0 : i32, i32
  }
  func.func @transform_5(%arg0: i32, %arg1: i32) -> (i32, i32) {
    %c0_i32 = arith.constant 0 : i32
    %c0_i32_0 = arith.constant 0 : i32
    %c0_i32_1 = arith.constant 0 : i32
    return %c0_i32, %c0_i32_0 : i32, i32
  }
  func.func @transform_6(%arg0: i32, %arg1: i32) -> (i32, i32, i32) {
    %c0_i32 = arith.constant 0 : i32
    %c0_i32_0 = arith.constant 0 : i32
    return %arg0, %c0_i32, %arg1 : i32, i32, i32
  }
}

</mosaic_0001>

<bundles_post_ra>
// kernel: tpu_custom_call.1
= control target key start
LH: loop header
LB: loop body
LE: loop exit
PB: predicated region body
PF: predicated region fallthrough
CT: control target
= control target key end

     0   :  { %s2802_s0 = inlined_call_operand.vmem [shape: f32[3], index: 0, kind: input, shape index: {}]   ;;  %s2803_s1 = inlined_call_operand.hbm [shape: f32[2,16,1024], index: 1, kind: input, shape index: {}]   ;;  %s2804_s2 = inlined_call_operand.vmem [shape: bf16[8,16], index: 2, kind: input, shape index: {}]   ;;  %s2805_s3 = inlined_call_operand.vmem [shape: f32[16,1], index: 3, kind: input, shape index: {}]   ;;  %s2806_s4 = inlined_call_operand.vmem [shape: f32[16,1], index: 4, kind: input, shape index: {}]   ;;  %s2807_s5 = inlined_call_operand.hbm [shape: bf16[1024,256], index: 5, kind: input, shape index: {}]   ;;  %s2808_s6 = inlined_call_operand.hbm [shape: f32[2,8,256], index: 6, kind: output, shape index: {}]  }
   0x1   :  { %2816 = sst [smem:[#allocation15_spill]] %s2802_s0 }
   0x2   :  { %11 = vsyncpa [#allocation5], 0 }
   0x3   :  { %12 = vsyncpa [#allocation3], 0 }
   0x4   :  { %14 = vsyncpa [#allocation3 + $0x1], 0 }
   0x5   :  { %15 = vsyncpa [#allocation8], 0 }
   0x6   :  { %16 = vsyncpa [#allocation4], 0 }
   0x7   :  { %18 = vsyncpa [#allocation4 + $0x1], 0  ;;  %s2492_s21 = smov 0   ;;  %s2494_s22 = smov 0  }
   0x8   :  { %s2496_s23 = smov 0   ;;  %s2498_s24 = smov 0  }
   0x9   :  { %s2500_s25 = smov 0   ;;  %s2502_s26 = smov 0  }
   0xa LB: > { %2817 = sst [smem:[#allocation14_spill]] %s2446_s26  ;;  %s1794_s27 = sadd.s32 4294967295, %s2446_s26   ;;  %s2446_s26 = sphi %s2502_s26, %s24_s26   ;;  %s2442_s25 = sphi %s2500_s25, %s2840_s25   ;;  %s2438_s24 = sphi %s2498_s24, %s2839_s24   ;;  %s2434_s23 = sphi %s2496_s23, %s2838_s23   ;;  %s2430_s22 = sphi %s2494_s22, %s2837_s22   ;;  %s2426_s21 = sphi %s2492_s21, %s2836_s21  }
   0xb   : > { %s1795_s28 = sadd.s32 4294967294, %s2446_s26   ;;  %p73_p0 = scmp.ne.s32.totalorder %s2434_s23, %s2430_s22 }
   0xc   : > { %p74_p1 = scmp.eq.s32.totalorder %s2446_s26, 0  ;;  %p79_p2 = scmp.ne.s32.totalorder %s2430_s22, %s2426_s21 }
   0xd   : > { %p2530_p3 = scmp.eq.s32.totalorder %s1794_s27, 0  ;;  %p189_p4 = scmp.eq.s32.totalorder %s1794_s27, 1 }
   0xe   : > { %p2534_p5 = por %p74_p1, %p73_p0  ;;  %p195_p6 = scmp.eq.s32.totalorder %s1795_s28, 1 }
   0xf   : > { %s2818_s30 = scalar_select %p2530_p3, 1, 0 }
  0x10   : > { %p2540_p7 = por %p2530_p3, %p79_p2  ;;  %p2544_p8 = por %p189_p4, %p73_p0 }
  0x11   : > { %p2548_p9 = por %p195_p6, %p79_p2  ;;  %p1796_p10 = scmp.ge.s32.totalorder %s2446_s26, 1 }
  0x12   : > { %s2820_s8 = scalar_select %p2540_p7, 1, 0 }
  0x13   : > { %s2821_s9 = scalar_select %p2544_p8, 1, 0 }
  0x14   : > { %s2822_s10 = scalar_select %p2548_p9, 1, 0 }
  0x15   : > { %p202_p11 = scmp.lt.s32.totalorder %s2446_s26, 3  ;;  %s2823_s0 = sld [smem:[#allocation15_spill]] }
  0x16   : > { %p2030_p0 = scmp.lt.s32.totalorder %s2446_s26, 2  ;;  %s2448_s16 = smov [#allocation7]  }
  0x17   : > { %p2557_p12 = pnand %p1796_p10, %p202_p11  ;;  %s234_s17 = sshll.u32 %s2448_s16, 4  ;;  %s2577_s17 = int_to_ptr.vmem [resolvable:$true] %s234_s17 }
  0x18   : > { %p2567_p2 = pnand %p2030_p0, %p2534_p5 }
  0x19   : > { %s2824_s14 = scalar_select %p2557_p12, 1, 0 }
  0x1a   : > { %p2013_p1 = pneg %p2557_p12 }
  0x1b   : > { %s215_s13 = sshll.u32 %s2823_s0, 4  ;;  %s216_s13 = int_to_ptr.vmem [resolvable:$true] %s215_s13 }
  0x1c   : > { %p2573_p4 = pnand %p2013_p1, %p2530_p3  ;;  %s2283_s19 = scalar_lea.vmem %s216_s13, 16 }
  0x1d   : > { %p2284_p6 = scmp.ne.s32.totalorder %s216_s13, %s2283_s19  ;;  %p2291_p0 = scmp.lt.s32.totalorder %s216_s13, %s216_s13 }
  0x1e   : > { %p2285_p10 = pneg %p2573_p4  ;;  %p2292_p13 = scmp.lt.s32.totalorder %s2283_s19, %s2283_s19 }
  0x20   : > { %p2286_p5 = pnand %p2285_p10, %p2284_p6  ;;  %p2293_p9 = por %p2292_p13, %p2291_p0 }
  0x22   : > { %p2287_p11 = pneg %p2286_p5 }
  0x24   : > { %p2294_p8 = pnand %p2293_p9, %p2287_p11 }
  0x26   : > { %2297 = shalt.err (!%p2294_p8)
}
  0x27   : > { %s2449_s20 = smov [#allocation2]   ;;  %s2298_s7 = scalar_lea.hbm %s2807_s5, 16384 }
  0x28   : > { %2016 = dma.vmem_to_smem (!%p2573_p4), %s216_s13, 16, %s2449_s20, [#allocation5]  }
  0x29   : > { %p2299_p1 = scmp.ne.s32.totalorder %s2807_s5, %s2298_s7  ;;  %p2305_p8 = scmp.lt.u32.totalorder %s2298_s7, %s2807_s5 }
  0x2b   : > { %p2301_p6 = pnand %p2299_p1, %p2285_p10 }
  0x2d   : > { %p2302_p5 = pneg %p2301_p6 }
  0x2f   : > { %p2307_p9 = pnand %p2305_p8, %p2302_p5 }
  0x31   : > { %2310 = shalt.err (!%p2307_p9)
}
  0x32   : > { %s2311_s13 = scalar_lea.vmem %s2577_s17, 16384  ;;  %p2319_p7 = scmp.lt.s32.totalorder %s2577_s17, %s2577_s17 }
  0x33   : > { %p2312_p13 = scmp.ne.s32.totalorder %s2577_s17, %s2311_s13  ;;  %p2320_p1 = scmp.lt.s32.totalorder %s2311_s13, %s2311_s13 }
  0x35   : > { %p2314_p11 = pnand %p2312_p13, %p2285_p10  ;;  %p2321_p6 = por %p2320_p1, %p2319_p7 }
  0x37   : > { %p2315_p0 = pneg %p2314_p11 }
  0x39   : > { %p2322_p3 = pnand %p2321_p6, %p2315_p0 }
  0x3b   : > { %2325 = shalt.err (!%p2322_p3)
}
  0x3c   : > { %s2450_s20 = smov 128   ;;  %s2451_s27 = smov 8  }
  0x3d   : > { %2019 = dma.hbm_to_vmem [thread:$0]  (!%p2573_p4), %s2807_s5, 16384, %s2577_s17, [#allocation8], %s2450_s20, %s2450_s20, %s2451_s27  }
  0x3e   : > { %s248_s11 = sand.u32 1, %s2434_s23   ;;  %s36_s12 = sadd.s32 1, %s2442_s25 }
  0x3f   : > { %s1800_s16 = sshll.u32 %s248_s11, 7  ;;  %p38_p7 = scmp.ge.s32.totalorder %s36_s12, 2 }
  0x40   : > { %s1947_s19 = sshll.u32 %s2442_s25, 11  ;;  %s252_s13 = scalar_lea.vmem [#allocation6], %s1800_s16 }
  0x41   : > { %s261_s29 = sshll.u32 %s252_s13, 4  ;;  %s2842_s12 = smov (%p38_p7, %s36_s12), 0  ;;  %s2621_s29 = int_to_ptr.vmem [resolvable:$true] %s261_s29 }
  0x42   : > { %s2619_s18 = scalar_lea.hbm %s2803_s1, %s1947_s19  ;;  %s61_s17 = ssub.s32 %s2442_s25, %s2842_s12 }
  0x43   : > { %p2625_p3 = scmp.eq.s32.totalorder %s61_s17, 0  ;;  %s2629_s27 = scalar_lea.sflag [#allocation3], %s248_s11 }
  0x44   : > { %s2326_s28 = scalar_lea.hbm %s2619_s18, 2048  ;;  %p2328_p10 = pneg %p2567_p2 }
  0x45   : > { %p2327_p4 = scmp.ne.s32.totalorder %s2619_s18, %s2326_s28  ;;  %s2331_s7 = scalar_lea.hbm %s2803_s1, 4096 }
  0x46   : > { %p2332_p9 = scmp.lt.u32.totalorder %s2619_s18, %s2803_s1  ;;  %p2333_p13 = scmp.lt.u32.totalorder %s2331_s7, %s2326_s28 }
  0x47   : > { %p2329_p5 = pnand %p2328_p10, %p2327_p4  ;;  %p2335_p0 = scmp.lt.u32.totalorder %s2326_s28, %s2619_s18 }
  0x48   : > { %p2334_p11 = por %p2333_p13, %p2332_p9 }
  0x49   : > { %p2330_p8 = pneg %p2329_p5 }
  0x4a   : > { %p2336_p1 = por %p2335_p0, %p2334_p11 }
  0x4c   : > { %p2337_p6 = pnand %p2336_p1, %p2330_p8 }
  0x4e   : > { %2340 = shalt.err (!%p2337_p6)
}
  0x4f   : > { %s2341_s11 = scalar_lea.vmem %s2621_s29, 2048  ;;  %s2452_s13 = smov [#allocation6]  }
  0x50   : > { %p2342_p7 = scmp.ne.s32.totalorder %s2621_s29, %s2341_s11  ;;  %s2346_s17 = sshll.u32 %s2452_s13, 4  ;;  %s2347_s17 = int_to_ptr.vmem [resolvable:$false] %s2346_s17 }
  0x51   : > { %s2348_s0 = scalar_lea.vmem %s2347_s17, 4096  ;;  %p2349_p12 = scmp.lt.s32.totalorder %s2621_s29, %s2347_s17 }
  0x52   : > { %p2344_p4 = pnand %p2342_p7, %p2328_p10  ;;  %p2350_p9 = scmp.lt.s32.totalorder %s2348_s0, %s2341_s11 }
  0x54   : > { %p2345_p5 = pneg %p2344_p4  ;;  %p2351_p13 = por %p2350_p9, %p2349_p12 }
  0x56   : > { %p2352_p11 = pnand %p2351_p13, %p2345_p5 }
  0x58   : > { %2355 = shalt.err (!%p2352_p11)
}
  0x59   : > { %s2453_s28 = smov 1024   ;;  %s2454_s26 = smov 64  }
  0x5a   : > { %2023 = dma.hbm_to_vmem [thread:$0]  (!%p2567_p2), %s2619_s18, 2048, %s2621_s29, %s2629_s27, %s2453_s28, %s2453_s28, %s2454_s26  }
  0x5b   : > { %s2828_s7 = sadd.s32 1, %s2434_s23  ;;  %p2829_p10 = scmp.ne.s32.totalorder %s2824_s14, 0 }
  0x5c   : > { %s2662_s16 = scalar_select %p2625_p3, %s2434_s23, %s2828_s7  }
  0x5d   : > { %273 = sbr.rel (%p2829_p10) target bundleno = 796 (0x31c), region = 44  ;;  %p2830_p12 = scmp.ne.s32.totalorder (!%p2829_p10), %s2818_s30, 0 }
  0x64   : > { %2409 = dma.done.wait (%p2830_p12), [#allocation5], 16  }
  0x65   : > { %2411 = vsyncadd (%p2830_p12), [#allocation5], 4294967280  ;;  %s2671_s19 = sand.u32 1, %s2430_s22   ;;  %p2831_p2 = scmp.ne.s32.totalorder %s2820_s8, 0 }
  0x66   : > { %s1805_s29 = sshll.u32 %s2671_s19, 7  ;;  %s280_s15 = scalar_lea.sflag [#allocation3], %s2671_s19 }
  0x67   : > { %s2675_s18 = scalar_lea.vmem [#allocation6], %s1805_s29 }
  0x68   : > { %2413 = dma.done.wait (%p2831_p2), %s280_s15, 2048  }
  0x69   : > { %2415 = vsyncadd (%p2831_p2), %s280_s15, 4294965248 }
  0x6a   : > { %2417 = dma.done.wait (%p2830_p12), [#allocation8], 16384  }
  0x6b   : > { %2419 = vsyncadd (%p2830_p12), [#allocation8], 4294950912 }
  0x6c   : > { %292 = sfence }
  0x6d   : > { %v432_v0 = vld [vmem:[%s2806_s4] sm:$0xff]  ;;  %v2455_v2 = vmov 0   ;;  %v433_v3 = vld [vmem:[%s2806_s4 + $0x8] sm:$0xff]  ;;  %s320_s0 = sld [smem:[#allocation2]]  ;;  %v326_v8 = vld [vmem:[%s2675_s18 + $0x18] sm:$0xff]  ;;  %vm517_vm0 = vcmask 130048  }
  0x6e   : > { %v404_v1 = vld [vmem:[%s2805_s3] sm:$0xff]  ;;  %2090 = vset.pattern.permute.xlu1 %v2455_v2  ;;  %2089 = vset.pattern.permute.xlu0 %v2455_v2  ;;  %v405_v4 = vld [vmem:[%s2805_s3 + $0x8] sm:$0xff]  ;;  %v325_v10 = vld [vmem:[%s2675_s18 + $0x10] sm:$0xff]  ;;  %s1808_s7 = sld [smem:[#allocation2 + $0x1]]  ;;  %s1809_s29 = sld [smem:[#allocation2 + $0x2]] }
  0x6f   : > { %436 = vperm.xlu1 %2090, %v432_v0   ;;  %408 = vperm.xlu0 %2089, %v404_v1   ;;  %v324_v5 = vld [vmem:[%s2675_s18 + $0x8] sm:$0xff]  ;;  %v323_v9 = vld [vmem:[%s2675_s18] sm:$0xff]  ;;  %v334_v11 = vld [vmem:[%s2675_s18 + $0x58] sm:$0xff]  ;;  %s1807_s15 = sshll.u32 %s2671_s19, 4  ;;  %s1672_s8 = scalar_lea.sflag [#allocation4], %s2671_s19 }
  0x70   : > { %553 = vmatprep.mubr.bf16.mxu0 %v2455_v2  ;;  %594 = vmatprep.mubr.bf16.mxu1 %v2455_v2  ;;  %v332_v6 = vld [vmem:[%s2675_s18 + $0x48] sm:$0xff]  ;;  %v330_v13 = vld [vmem:[%s2675_s18 + $0x38] sm:$0xff]  ;;  %v331_v14 = vld [vmem:[%s2675_s18 + $0x40] sm:$0xff]  ;;  %s316_s14 = scalar_lea.vmem [#allocation9], %s1807_s15  ;;  %p2832_p8 = scmp.ne.s32.totalorder %s2821_s9, 0 }
  0x71   : > { %v328_v12 = vld [vmem:[%s2675_s18 + $0x28] sm:$0xff]  ;;  %v333_v15 = vld [vmem:[%s2675_s18 + $0x50] sm:$0xff]  ;;  %v338_v21 = vld [vmem:[%s2675_s18 + $0x78] sm:$0xff]  ;;  %s1688_s20 = sshll.u32 %s316_s14, 4  ;;  %s2755_s20 = int_to_ptr.vmem [resolvable:$true] %s1688_s20 }
  0x72   : > { %v336_v16 = vld [vmem:[%s2675_s18 + $0x68] sm:$0xff]  ;;  %v327_v22 = vld [vmem:[%s2675_s18 + $0x20] sm:$0xff]  ;;  %v329_v23 = vld [vmem:[%s2675_s18 + $0x30] sm:$0xff]  ;;  %s2356_s13 = scalar_lea.vmem %s2755_s20, 256 }
  0x73   : > { %441 = vperm.xlu1 %2090, %v433_v3   ;;  %413 = vperm.xlu0 %2089, %v405_v4   ;;  %v339_v7 = vstv %s320_s0  ;;  %v335_v30 = vld [vmem:[%s2675_s18 + $0x60] sm:$0xff]  ;;  %v337_v31 = vld [vmem:[%s2675_s18 + $0x70] sm:$0xff]  ;;  %s1948_s18 = sshll.u32 %s2438_s24, 8  ;;  %p2357_p3 = scmp.ne.s32.totalorder %s2755_s20, %s2356_s13 }
  0x74   : > { %v341_v17 = vmul.f32 %v339_v7, %v324_v5  ;;  %v343_v18 = vmul.f32 %v339_v7, %v326_v8  ;;  %v340_v19 = vmul.f32 %v339_v7, %v323_v9  ;;  %v342_v20 = vmul.f32 %v339_v7, %v325_v10  ;;  %s2753_s30 = scalar_lea.hbm %s2808_s6, %s1948_s18  ;;  %s2456_s24 = smov [#allocation9]  }
  0x75   : > { %v345_v24 = vmul.f32 %v339_v7, %v328_v12  ;;  %v347_v25 = vmul.f32 %v339_v7, %v330_v13  ;;  %v349_v26 = vmul.f32 %v339_v7, %v332_v6  ;;  %v351_v27 = vmul.f32 %v339_v7, %v334_v11  ;;  %p2358_p0 = pnand %p2357_p3, %p2832_p8  ;;  %s2360_s17 = sshll.u32 %s2456_s24, 4  ;;  %s2361_s17 = int_to_ptr.vmem [resolvable:$false] %s2360_s17 }
  0x76   : > { %v348_v28 = vmul.f32 %v339_v7, %v331_v14  ;;  %v350_v29 = vmul.f32 %v339_v7, %v333_v15  ;;  %v353_v32 = vmul.f32 %v339_v7, %v336_v16  ;;  %v355_v33 = vmul.f32 %v339_v7, %v338_v21  ;;  %s2362_s0 = scalar_lea.vmem %s2361_s17, 512  ;;  %p2363_p6 = scmp.lt.s32.totalorder %s2755_s20, %s2361_s17 }
  0x77   : > { %v344_v34 = vmul.f32 %v339_v7, %v327_v22  ;;  %v346_v35 = vmul.f32 %v339_v7, %v329_v23  ;;  %v1960_v36 = vround.rtne.f32 %v341_v17  ;;  %v1962_v37 = vround.rtne.f32 %v343_v18  ;;  %p2359_p1 = pneg %p2358_p0  ;;  %p2364_p7 = scmp.lt.s32.totalorder %s2362_s0, %s2356_s13 }
  0x78   : > { %v1959_v38 = vround.rtne.f32 %v340_v19  ;;  %v1961_v39 = vround.rtne.f32 %v342_v20  ;;  %v1964_v40 = vround.rtne.f32 %v345_v24  ;;  %v1966_v41 = vround.rtne.f32 %v347_v25 }
  0x79   : > { %v352_v42 = vmul.f32 %v339_v7, %v335_v30  ;;  %v354_v43 = vmul.f32 %v339_v7, %v337_v31  ;;  %v1968_v44 = vround.rtne.f32 %v349_v26  ;;  %v1970_v45 = vround.rtne.f32 %v351_v27  ;;  %p2365_p4 = por %p2364_p7, %p2363_p6 }
  0x7a   : > { %v1967_v46 = vround.rtne.f32 %v348_v28  ;;  %v1969_v47 = vround.rtne.f32 %v350_v29  ;;  %v1972_v48 = vround.rtne.f32 %v353_v32  ;;  %v1974_v49 = vround.rtne.f32 %v355_v33 }
  0x7b   : > { %v1963_v50 = vround.rtne.f32 %v344_v34  ;;  %v1965_v51 = vround.rtne.f32 %v346_v35  ;;  %v373_v52 = vmax.f32 %v1960_v36, -64.0  ;;  %v375_v53 = vmax.f32 %v1962_v37, -64.0  ;;  %p2366_p5 = pnand %p2365_p4, %p2359_p1 }
  0x7c   : > { %v372_v54 = vmax.f32 %v1959_v38, -64.0  ;;  %v374_v55 = vmax.f32 %v1961_v39, -64.0  ;;  %v377_v56 = vmax.f32 %v1964_v40, -64.0  ;;  %v379_v57 = vmax.f32 %v1966_v41, -64.0 }
  0x7d   : > { %v1971_v58 = vround.rtne.f32 %v352_v42  ;;  %v1973_v59 = vround.rtne.f32 %v354_v43  ;;  %v381_v60 = vmax.f32 %v1968_v44, -64.0  ;;  %v383_v61 = vmax.f32 %v1970_v45, -64.0 }
  0x7e   : > { %v380_v62 = vmax.f32 %v1967_v46, -64.0  ;;  %v382_v63 = vmax.f32 %v1969_v47, -64.0  ;;  %v2717_v0 = vmax.f32 %v1972_v48, -64.0  ;;  %v2719_v1 = vmax.f32 %v1974_v49, -64.0 }
  0x7f   : > { %v376_v3 = vmax.f32 %v1963_v50, -64.0  ;;  %v378_v4 = vmax.f32 %v1965_v51, -64.0  ;;  %v389_v5 = vmin.f32 %v373_v52, 191.0  ;;  %v391_v6 = vmin.f32 %v375_v53, 191.0 }
  0x80   : > { %v388_v7 = vmin.f32 %v372_v54, 191.0  ;;  %v390_v8 = vmin.f32 %v374_v55, 191.0  ;;  %v393_v9 = vmin.f32 %v377_v56, 191.0  ;;  %v395_v10 = vmin.f32 %v379_v57, 191.0 }
  0x81   : > { %v2721_v11 = vmax.f32 %v1971_v58, -64.0  ;;  %v2723_v12 = vmax.f32 %v1973_v59, -64.0  ;;  %v397_v13 = vmin.f32 %v381_v60, 191.0  ;;  %v399_v14 = vmin.f32 %v383_v61, 191.0 }
  0x82   : > { %v396_v15 = vmin.f32 %v380_v62, 191.0  ;;  %v398_v16 = vmin.f32 %v382_v63, 191.0  ;;  %v401_v19 = vmin.f32 %v2717_v0, 191.0  ;;  %v403_v20 = vmin.f32 %v2719_v1, 191.0 }
  0x83   : > { %v392_v21 = vmin.f32 %v376_v3, 191.0  ;;  %v394_v22 = vmin.f32 %v378_v4, 191.0  ;;  %v400_v29 = vmin.f32 %v2721_v11, 191.0  ;;  %v402_v30 = vmin.f32 %v2723_v12, 191.0 }
  0xee   : > { %v437_v17 = vpop.permute.xlu1 %436  ;;  %v409_v18 = vpop.permute.xlu0 %408 }
  0xef   : > { %v417_v23 = vmul.f32 %v409_v18, %v389_v5  ;;  %v419_v24 = vmul.f32 %v409_v18, %v391_v6  ;;  %v416_v25 = vmul.f32 %v409_v18, %v388_v7  ;;  %v418_v26 = vmul.f32 %v409_v18, %v390_v8 }
  0xf0   : > { %v421_v27 = vmul.f32 %v409_v18, %v393_v9  ;;  %v423_v28 = vmul.f32 %v409_v18, %v395_v10  ;;  %v420_v38 = vmul.f32 %v409_v18, %v392_v21  ;;  %v422_v39 = vmul.f32 %v409_v18, %v394_v22 }
  0xf1   : > { %v445_v31 = vadd.f32 %v437_v17, %v417_v23  ;;  %v447_v32 = vadd.f32 %v437_v17, %v419_v24  ;;  %v444_v33 = vadd.f32 %v437_v17, %v416_v25  ;;  %v446_v34 = vadd.f32 %v437_v17, %v418_v26 }
  0xf2   : > { %v414_v35 = vpop.permute.xlu0 %413  ;;  %v449_v36 = vadd.f32 %v437_v17, %v421_v27  ;;  %v451_v37 = vadd.f32 %v437_v17, %v423_v28  ;;  %v442_v44 = vpop.permute.xlu1 %441  ;;  %v448_v55 = vadd.f32 %v437_v17, %v420_v38  ;;  %v450_v56 = vadd.f32 %v437_v17, %v422_v39 }
  0xf3   : > { %v425_v40 = vmul.f32 %v414_v35, %v397_v13  ;;  %v1976_v41 = vround.rtne.f32 %v445_v31  ;;  %v427_v42 = vmul.f32 %v414_v35, %v399_v14  ;;  %v1978_v43 = vround.rtne.f32 %v447_v32 }
  0xf4   : > { %v424_v45 = vmul.f32 %v414_v35, %v396_v15  ;;  %v1975_v46 = vround.rtne.f32 %v444_v33  ;;  %v426_v47 = vmul.f32 %v414_v35, %v398_v16  ;;  %v1977_v48 = vround.rtne.f32 %v446_v34 }
  0xf5   : > { %v453_v49 = vadd.f32 %v442_v44, %v425_v40  ;;  %v477_v50 = vmax.f32 %v1976_v41, 0.0  ;;  %v455_v51 = vadd.f32 %v442_v44, %v427_v42  ;;  %v479_v52 = vmax.f32 %v1978_v43, 0.0 }
  0xf6   : > { %v452_v53 = vadd.f32 %v442_v44, %v424_v45  ;;  %v454_v54 = vadd.f32 %v442_v44, %v426_v47  ;;  %v476_v59 = vmax.f32 %v1975_v46, 0.0  ;;  %v478_v60 = vmax.f32 %v1977_v48, 0.0 }
  0xf7   : > { %v1984_v57 = vround.rtne.f32 %v453_v49  ;;  %v1986_v58 = vround.rtne.f32 %v455_v51  ;;  %v493_v61 = vmin.f32 %v477_v50, 255.0  ;;  %v495_v62 = vmin.f32 %v479_v52, 255.0  ;;  %v2093_v51 = vld [vmem:[#allocation7 + $0x4] ss:$8 sps:$4 sm:$0xff]  }
  0xf8   : > { %v1983_v63 = vround.rtne.f32 %v452_v53  ;;  %v1985_v0 = vround.rtne.f32 %v454_v54  ;;  %v429_v4 = vmul.f32 %v414_v35, %v401_v19  ;;  %v1980_v5 = vround.rtne.f32 %v449_v36  ;;  %v508_v36 = vld [vmem:[%s2804_s2] sm:$0xf]  ;;  %v2102_v52 = vld [vmem:[#allocation7 + $0x204] ss:$8 sps:$4 sm:$0xff]  }
  0xf9   : > { %v485_v1 = vmax.f32 %v1984_v57, 0.0  ;;  %v487_v3 = vmax.f32 %v1986_v58, 0.0  ;;  %v431_v8 = vmul.f32 %v414_v35, %v403_v20  ;;  %v1982_v9 = vround.rtne.f32 %v451_v37  ;;  %v2096_v57 = vld [vmem:[#allocation7 + $0x14] ss:$8 sps:$4 sm:$0xff]   ;;  %v2094_v58 = vld [vmem:[#allocation7 + $0x10] ss:$8 sps:$4 sm:$0xff]  }
  0xfa   : > { %v484_v6 = vmax.f32 %v1983_v63, 0.0  ;;  %v486_v7 = vmax.f32 %v1985_v0, 0.0  ;;  %v492_v14 = vmin.f32 %v476_v59, 255.0  ;;  %v457_v15 = vadd.f32 %v442_v44, %v429_v4  ;;  %v2106_v59 = vld [vmem:[#allocation7 + $0x210] ss:$8 sps:$4 sm:$0xff]  }
  0xfb   : > { %v501_v10 = vmin.f32 %v485_v1, 255.0  ;;  %v503_v13 = vmin.f32 %v487_v3, 255.0  ;;  %v494_v17 = vmin.f32 %v478_v60, 255.0  ;;  %v459_v21 = vadd.f32 %v442_v44, %v431_v8  ;;  %v2099_v60 = vld [vmem:[#allocation7 + $0x24] ss:$8 sps:$4 sm:$0xff]  }
  0xfc   : > { %v500_v16 = vmin.f32 %v484_v6, 255.0  ;;  %v502_v18 = vmin.f32 %v486_v7, 255.0  ;;  %v1988_v24 = vround.rtne.f32 %v457_v15  ;;  %v481_v25 = vmax.f32 %v1980_v5, 0.0  ;;  %v2112_v63 = vld [vmem:[#allocation7 + $0x220] ss:$8 sps:$4 sm:$0xff]  }
  0xfd   : > { %v510_v22 = vpack.c.bf16 %v501_v10, %v493_v61  ;;  %v512_v23 = vpack.c.bf16 %v503_v13, %v495_v62  ;;  %v1990_v19 = vround.rtne.f32 %v459_v21  ;;  %v483_v28 = vmax.f32 %v1982_v9, 0.0  ;;  %v2114_v61 = vld [vmem:[#allocation7 + $0x224] ss:$8 sps:$4 sm:$0xff]   ;;  %v2097_v62 = vld [vmem:[#allocation7 + $0x20] ss:$8 sps:$4 sm:$0xff]  }
  0xfe   : > { %v509_v26 = vpack.c.bf16 %v500_v16, %v492_v14  ;;  %v511_v27 = vpack.c.bf16 %v502_v18, %v494_v17  ;;  %v489_v20 = vmax.f32 %v1988_v24, 0.0  ;;  %v428_v31 = vmul.f32 %v414_v35, %v400_v29  ;;  %v2105_v0 = vld [vmem:[#allocation7 + $0x34] ss:$8 sps:$4 sm:$0xff]   ;;  %v2103_v3 = vld [vmem:[#allocation7 + $0x30] ss:$8 sps:$4 sm:$0xff]  }
  0xff   : > { %521 = vmatprep.subr.bf16.mxu0 %v510_v22  ;;  %562 = vmatprep.subr.bf16.mxu1 %v512_v23  ;;  %v1979_v32 = vround.rtne.f32 %v448_v55  ;;  %v430_v33 = vmul.f32 %v414_v35, %v402_v30  ;;  %v491_v34 = vmax.f32 %v1990_v19, 0.0  ;;  %v1981_v37 = vround.rtne.f32 %v450_v56  ;;  %v2091_v55 = vld [vmem:[#allocation7] ss:$8 sps:$4 sm:$0xff]   ;;  %v2120_v1 = vld [vmem:[#allocation7 + $0x234] ss:$8 sps:$4 sm:$0xff]  }
 0x100   : > { %522 = vmatpush1.bf16.msra.mxu0 %v509_v26  ;;  %563 = vmatpush1.bf16.msra.mxu1 %v511_v27  ;;  %v497_v38 = vmin.f32 %v481_v25, 255.0  ;;  %v505_v39 = vmin.f32 %v489_v20, 255.0  ;;  %v456_v40 = vadd.f32 %v442_v44, %v428_v31  ;;  %v499_v42 = vmin.f32 %v483_v28, 255.0  ;;  %v2100_v56 = vld [vmem:[#allocation7 + $0x200] ss:$8 sps:$4 sm:$0xff]  }
 0x101   : > { %v458_v41 = vadd.f32 %v442_v44, %v430_v33  ;;  %v507_v11 = vmin.f32 %v491_v34, 255.0  ;;  %v480_v29 = vmax.f32 %v1979_v32, 0.0  ;;  %v482_v35 = vmax.f32 %v1981_v37, 0.0  ;;  %v2118_v4 = vld [vmem:[#allocation7 + $0x230] ss:$8 sps:$4 sm:$0xff]  }
 0x102   : > { %v514_v43 = vpack.c.bf16 %v505_v39, %v497_v38  ;;  %v1987_v12 = vround.rtne.f32 %v456_v40  ;;  %v2111_v5 = vld [vmem:[#allocation7 + $0x44] ss:$8 sps:$4 sm:$0xff]   ;;  %v2109_v7 = vld [vmem:[#allocation7 + $0x40] ss:$8 sps:$4 sm:$0xff]   ;;  %v2117_v9 = vld [vmem:[#allocation7 + $0x54] ss:$8 sps:$4 sm:$0xff]  }
 0x103   : > { %1810 = vmatmul.mubr.msk.bf16.vlgmr.msra.gmra.mrb[0].mxu0 %vm517_vm0, %v508_v36  ;;  %1811 = vmatmul.mubr.msk.bf16.vlgmr.msra.gmra.mrb[0].mxu1 %vm517_vm0, %v508_v36  ;;  %v1989_v30 = vround.rtne.f32 %v458_v41  ;;  %v516_v45 = vpack.c.bf16 %v507_v11, %v499_v42  ;;  %v496_v44 = vmin.f32 %v480_v29, 255.0  ;;  %v498_v49 = vmin.f32 %v482_v35, 255.0  ;;  %v2126_v6 = vld [vmem:[#allocation7 + $0x244] ss:$8 sps:$4 sm:$0xff]   ;;  %v2124_v8 = vld [vmem:[#allocation7 + $0x240] ss:$8 sps:$4 sm:$0xff]  }
 0x104   : > { %635 = vmatprep.mubr.bf16.mxu0 %v2455_v2  ;;  %676 = vmatprep.mubr.bf16.mxu1 %v2455_v2  ;;  %v488_v46 = vmax.f32 %v1987_v12, 0.0  ;;  %v2108_v2 = vld [vmem:[#allocation7 + $0x214] ss:$8 sps:$4 sm:$0xff]   ;;  %v2115_v13 = vld [vmem:[#allocation7 + $0x50] ss:$8 sps:$4 sm:$0xff]  }
 0x105   : > { %603 = vmatprep.subr.bf16.mxu0 %v514_v43  ;;  %v490_v47 = vmax.f32 %v1989_v30, 0.0  ;;  %644 = vmatprep.subr.bf16.mxu1 %v516_v45  ;;  %v2132_v10 = vld [vmem:[#allocation7 + $0x254] ss:$8 sps:$4 sm:$0xff]   ;;  %v2130_v14 = vld [vmem:[#allocation7 + $0x250] ss:$8 sps:$4 sm:$0xff]  }
 0x106   : > { %v504_v48 = vmin.f32 %v488_v46, 255.0  ;;  %v2123_v15 = vld [vmem:[#allocation7 + $0x64] ss:$8 sps:$4 sm:$0xff]   ;;  %v2121_v17 = vld [vmem:[#allocation7 + $0x60] ss:$8 sps:$4 sm:$0xff]  }
 0x107   : > { %v506_v50 = vmin.f32 %v490_v47, 255.0  ;;  %v2138_v16 = vld [vmem:[#allocation7 + $0x264] ss:$8 sps:$4 sm:$0xff]   ;;  %v2136_v18 = vld [vmem:[#allocation7 + $0x260] ss:$8 sps:$4 sm:$0xff]  }
 0x108   : > { %v513_v53 = vpack.c.bf16 %v504_v48, %v496_v44  ;;  %v2129_v21 = vld [vmem:[#allocation7 + $0x74] ss:$8 sps:$4 sm:$0xff]   ;;  %v2127_v23 = vld [vmem:[#allocation7 + $0x70] ss:$8 sps:$4 sm:$0xff]   ;;  %v2135_v25 = vld [vmem:[#allocation7 + $0x84] ss:$8 sps:$4 sm:$0xff]  }
 0x109   : > { %v515_v54 = vpack.c.bf16 %v506_v50, %v498_v49  ;;  %v2144_v22 = vld [vmem:[#allocation7 + $0x274] ss:$8 sps:$4 sm:$0xff]   ;;  %v2142_v24 = vld [vmem:[#allocation7 + $0x270] ss:$8 sps:$4 sm:$0xff]   ;;  %v2150_v26 = vld [vmem:[#allocation7 + $0x284] ss:$8 sps:$4 sm:$0xff]  }
 0x10a   : > { %604 = vmatpush1.bf16.msra.mxu0 %v513_v53  ;;  %v2133_v27 = vld [vmem:[#allocation7 + $0x80] ss:$8 sps:$4 sm:$0xff]   ;;  %v2141_v28 = vld [vmem:[#allocation7 + $0x94] ss:$8 sps:$4 sm:$0xff]   ;;  %v2139_v31 = vld [vmem:[#allocation7 + $0x90] ss:$8 sps:$4 sm:$0xff]  }
 0x10b   : > { %645 = vmatpush1.bf16.msra.mxu1 %v515_v54  ;;  %1576 = vmatprep.subr.bf16.mxu0 %v2102_v52  ;;  %v2148_v19 = vld [vmem:[#allocation7 + $0x280] ss:$8 sps:$4 sm:$0xff]   ;;  %v2156_v20 = vld [vmem:[#allocation7 + $0x294] ss:$8 sps:$4 sm:$0xff]   ;;  %v2154_v32 = vld [vmem:[#allocation7 + $0x290] ss:$8 sps:$4 sm:$0xff]  }
 0x10c   : > { %1494 = vmatprep.subr.bf16.mxu1 %v2093_v51  ;;  %v2147_v33 = vld [vmem:[#allocation7 + $0xa4] ss:$8 sps:$4 sm:$0xff]   ;;  %v2160_v37 = vld [vmem:[#allocation7 + $0x2a0] ss:$8 sps:$4 sm:$0xff]   ;;  %v2153_v38 = vld [vmem:[#allocation7 + $0xb4] ss:$8 sps:$4 sm:$0xff]  }
 0x10d   : > { %1812 = vmatmul.mubr.msk.bf16.vlgmr.msra.gmra.mrb[4].mxu0 %vm517_vm0, %v508_v36  ;;  %v2162_v34 = vld [vmem:[#allocation7 + $0x2a4] ss:$8 sps:$4 sm:$0xff]   ;;  %v2151_v39 = vld [vmem:[#allocation7 + $0xb0] ss:$8 sps:$4 sm:$0xff]   ;;  %v2157_v41 = vld [vmem:[#allocation7 + $0xc0] ss:$8 sps:$4 sm:$0xff]  }
 0x10e   : > { %1813 = vmatmul.mubr.msk.bf16.vlgmr.msra.gmra.mrb[4].mxu1 %vm517_vm0, %v508_v36  ;;  %1577 = vmatpush1.bf16.msra.mxu0 %v2100_v56  ;;  %v2145_v36 = vld [vmem:[#allocation7 + $0xa0] ss:$8 sps:$4 sm:$0xff]   ;;  %v2159_v40 = vld [vmem:[#allocation7 + $0xc4] ss:$8 sps:$4 sm:$0xff]   ;;  %v2163_v42 = vld [vmem:[#allocation7 + $0xd0] ss:$8 sps:$4 sm:$0xff]  }
 0x10f   : > { %1495 = vmatpush1.bf16.msra.mxu1 %v2091_v55  ;;  %1578 = vmatprep.subr.bf16.mxu0 %v2108_v2  ;;  %v2165_v11 = vld [vmem:[#allocation7 + $0xd4] ss:$8 sps:$4 sm:$0xff]   ;;  %v2166_v29 = vld [vmem:[#allocation7 + $0x2b0] ss:$8 sps:$4 sm:$0xff]   ;;  %v2171_v12 = vld [vmem:[#allocation7 + $0xe4] ss:$8 sps:$4 sm:$0xff]   ;;  %v685_v55 = vstv %s1808_s7 }
 0x110   : > { %1496 = vmatprep.subr.bf16.mxu1 %v2096_v57  ;;  %v2168_v43 = vld [vmem:[#allocation7 + $0x2b4] ss:$8 sps:$4 sm:$0xff]   ;;  %v2174_v30 = vld [vmem:[#allocation7 + $0x2c4] ss:$8 sps:$4 sm:$0xff]   ;;  %v2169_v35 = vld [vmem:[#allocation7 + $0xe0] ss:$8 sps:$4 sm:$0xff]  }
 0x111   : > { %v2172_v45 = vld [vmem:[#allocation7 + $0x2c0] ss:$8 sps:$4 sm:$0xff]   ;;  %v2177_v46 = vld [vmem:[#allocation7 + $0xf4] ss:$8 sps:$4 sm:$0xff]   ;;  %v2175_v44 = vld [vmem:[#allocation7 + $0xf0] ss:$8 sps:$4 sm:$0xff]  }
 0x112   : > { %1579 = vmatpush1.bf16.msra.mxu0 %v2106_v59  ;;  %v2180_v47 = vld [vmem:[#allocation7 + $0x2d4] ss:$8 sps:$4 sm:$0xff]   ;;  %v2178_v48 = vld [vmem:[#allocation7 + $0x2d0] ss:$8 sps:$4 sm:$0xff]   ;;  %v2183_v49 = vld [vmem:[#allocation7 + $0x104] ss:$8 sps:$4 sm:$0xff]  }
 0x113   : > { %1497 = vmatpush1.bf16.msra.mxu1 %v2094_v58  ;;  %1580 = vmatprep.subr.bf16.mxu0 %v2114_v61  ;;  %v2184_v50 = vld [vmem:[#allocation7 + $0x2e0] ss:$8 sps:$4 sm:$0xff]   ;;  %v2186_v51 = vld [vmem:[#allocation7 + $0x2e4] ss:$8 sps:$4 sm:$0xff]   ;;  %v2192_v52 = vld [vmem:[#allocation7 + $0x2f4] ss:$8 sps:$4 sm:$0xff]  }
 0x114   : > { %1498 = vmatprep.subr.bf16.mxu1 %v2099_v60  ;;  %v2190_v53 = vld [vmem:[#allocation7 + $0x2f0] ss:$8 sps:$4 sm:$0xff]   ;;  %v2198_v54 = vld [vmem:[#allocation7 + $0x304] ss:$8 sps:$4 sm:$0xff]  }
 0x116   : > { %1581 = vmatpush1.bf16.msra.mxu0 %v2112_v63 }
 0x117   : > { %1499 = vmatpush1.bf16.msra.mxu1 %v2097_v62  ;;  %1582 = vmatprep.subr.bf16.mxu0 %v2120_v1 }
 0x118   : > { %1500 = vmatprep.subr.bf16.mxu1 %v2105_v0 }
 0x11a   : > { %1583 = vmatpush1.bf16.msra.mxu0 %v2118_v4 }
 0x11b   : > { %1501 = vmatpush1.bf16.msra.mxu1 %v2103_v3  ;;  %1584 = vmatprep.subr.bf16.mxu0 %v2126_v6 }
 0x11c   : > { %1502 = vmatprep.subr.bf16.mxu1 %v2111_v5 }
 0x11e   : > { %1585 = vmatpush1.bf16.msra.mxu0 %v2124_v8 }
 0x11f   : > { %1503 = vmatpush1.bf16.msra.mxu1 %v2109_v7  ;;  %1586 = vmatprep.subr.bf16.mxu0 %v2132_v10 }
 0x120   : > { %1504 = vmatprep.subr.bf16.mxu1 %v2117_v9 }
 0x122   : > { %1587 = vmatpush1.bf16.msra.mxu0 %v2130_v14 }
 0x123   : > { %1505 = vmatpush1.bf16.msra.mxu1 %v2115_v13  ;;  %1588 = vmatprep.subr.bf16.mxu0 %v2138_v16  ;;  %v2181_v16 = vld [vmem:[#allocation7 + $0x100] ss:$8 sps:$4 sm:$0xff]  }
 0x124   : > { %1506 = vmatprep.subr.bf16.mxu1 %v2123_v15 }
 0x126   : > { %1589 = vmatpush1.bf16.msra.mxu0 %v2136_v18 }
 0x127   : > { %1507 = vmatpush1.bf16.msra.mxu1 %v2121_v17  ;;  %1590 = vmatprep.subr.bf16.mxu0 %v2144_v22  ;;  %v2189_v22 = vld [vmem:[#allocation7 + $0x114] ss:$8 sps:$4 sm:$0xff]  }
 0x128   : > { %1508 = vmatprep.subr.bf16.mxu1 %v2129_v21 }
 0x12a   : > { %1591 = vmatpush1.bf16.msra.mxu0 %v2142_v24 }
 0x12b   : > { %1509 = vmatpush1.bf16.msra.mxu1 %v2127_v23  ;;  %1592 = vmatprep.subr.bf16.mxu0 %v2150_v26 }
 0x12c   : > { %1510 = vmatprep.subr.bf16.mxu1 %v2135_v25 }
 0x12e   : > { %1593 = vmatpush1.bf16.msra.mxu0 %v2148_v19 }
 0x12f   : > { %1511 = vmatpush1.bf16.msra.mxu1 %v2133_v27  ;;  %1594 = vmatprep.subr.bf16.mxu0 %v2156_v20 }
 0x130   : > { %1512 = vmatprep.subr.bf16.mxu1 %v2141_v28 }
 0x132   : > { %1595 = vmatpush1.bf16.msra.mxu0 %v2154_v32 }
 0x133   : > { %1513 = vmatpush1.bf16.msra.mxu1 %v2139_v31  ;;  %1596 = vmatprep.subr.bf16.mxu0 %v2162_v34  ;;  %v2187_v34 = vld [vmem:[#allocation7 + $0x110] ss:$8 sps:$4 sm:$0xff]  }
 0x134   : > { %1514 = vmatprep.subr.bf16.mxu1 %v2147_v33 }
 0x136   : > { %1597 = vmatpush1.bf16.msra.mxu0 %v2160_v37 }
 0x137   : > { %1515 = vmatpush1.bf16.msra.mxu1 %v2145_v36  ;;  %1598 = vmatprep.subr.bf16.mxu0 %v2168_v43 }
 0x138   : > { %1516 = vmatprep.subr.bf16.mxu1 %v2153_v38  ;;  %v2195_v38 = vld [vmem:[#allocation7 + $0x124] ss:$8 sps:$4 sm:$0xff]  }
 0x13a   : > { %1599 = vmatpush1.bf16.msra.mxu0 %v2166_v29  ;;  %v2193_v29 = vld [vmem:[#allocation7 + $0x120] ss:$8 sps:$4 sm:$0xff]  }
 0x13b   : > { %1517 = vmatpush1.bf16.msra.mxu1 %v2151_v39  ;;  %1600 = vmatprep.subr.bf16.mxu0 %v2174_v30 }
 0x13c   : > { %1518 = vmatprep.subr.bf16.mxu1 %v2159_v40 }
 0x13e   : > { %1601 = vmatpush1.bf16.msra.mxu0 %v2172_v45  ;;  %v2196_v45 = vld [vmem:[#allocation7 + $0x300] ss:$8 sps:$4 sm:$0xff]  }
 0x13f   : > { %1519 = vmatpush1.bf16.msra.mxu1 %v2157_v41  ;;  %1602 = vmatprep.subr.bf16.mxu0 %v2180_v47 }
 0x140   : > { %1520 = vmatprep.subr.bf16.mxu1 %v2165_v11 }
 0x142   : > { %1603 = vmatpush1.bf16.msra.mxu0 %v2178_v48  ;;  %v2204_v48 = vld [vmem:[#allocation7 + $0x314] ss:$8 sps:$4 sm:$0xff]  }
 0x143   : > { %1521 = vmatpush1.bf16.msra.mxu1 %v2163_v42  ;;  %1604 = vmatprep.subr.bf16.mxu0 %v2186_v51  ;;  %v2205_v51 = vld [vmem:[#allocation7 + $0x140] ss:$8 sps:$4 sm:$0xff]  }
 0x144   : > { %1522 = vmatprep.subr.bf16.mxu1 %v2171_v12  ;;  %v2201_v12 = vld [vmem:[#allocation7 + $0x134] ss:$8 sps:$4 sm:$0xff]  }
 0x146   : > { %1605 = vmatpush1.bf16.msra.mxu0 %v2184_v50  ;;  %v2202_v50 = vld [vmem:[#allocation7 + $0x310] ss:$8 sps:$4 sm:$0xff]  }
 0x147   : > { %1523 = vmatpush1.bf16.msra.mxu1 %v2169_v35  ;;  %1606 = vmatprep.subr.bf16.mxu0 %v2192_v52  ;;  %v2210_v52 = vld [vmem:[#allocation7 + $0x324] ss:$8 sps:$4 sm:$0xff]  }
 0x148   : > { %1524 = vmatprep.subr.bf16.mxu1 %v2177_v46 }
 0x14a   : > { %1607 = vmatpush1.bf16.msra.mxu0 %v2190_v53  ;;  %v2213_v53 = vld [vmem:[#allocation7 + $0x154] ss:$8 sps:$4 sm:$0xff]  }
 0x14b   : > { %1525 = vmatpush1.bf16.msra.mxu1 %v2175_v44  ;;  %1617 = vmatprep.subr.bf16.mxu0 %v2198_v54  ;;  %v2199_v44 = vld [vmem:[#allocation7 + $0x130] ss:$8 sps:$4 sm:$0xff]   ;;  %v2208_v54 = vld [vmem:[#allocation7 + $0x320] ss:$8 sps:$4 sm:$0xff]  }
 0x14c   : > { %1535 = vmatprep.subr.bf16.mxu1 %v2183_v49  ;;  %v2207_v49 = vld [vmem:[#allocation7 + $0x144] ss:$8 sps:$4 sm:$0xff]  }
 0x1d6   : > { %v555_v56 = vpop.f32.mrb[0].mxu0  ;;  %v596_v57 = vpop.f32.mrb[0].mxu1 }
 0x1d7   : > { %v686_v2 = vmul.f32 %v685_v55, %v555_v56  ;;  %v557_v58 = vpop.f32.mrb[1].mxu0  ;;  %v2742_v59 = vmul.f32 %v685_v55, %v596_v57  ;;  %v598_v60 = vpop.f32.mrb[1].mxu1  ;;  %v2216_v56 = vld [vmem:[#allocation7 + $0x334] ss:$8 sps:$4 sm:$0xff]   ;;  %v2219_v57 = vld [vmem:[#allocation7 + $0x164] ss:$8 sps:$4 sm:$0xff]  }
 0x1d8   : > { %v687_v61 = vmul.f32 %v685_v55, %v557_v58  ;;  %v559_v62 = vpop.f32.mrb[2].mxu0  ;;  %v689_v63 = vmul.f32 %v685_v55, %v598_v60  ;;  %v600_v0 = vpop.f32.mrb[2].mxu1  ;;  %v2217_v58 = vld [vmem:[#allocation7 + $0x160] ss:$8 sps:$4 sm:$0xff]   ;;  %v2222_v60 = vld [vmem:[#allocation7 + $0x344] ss:$8 sps:$4 sm:$0xff]  }
 0x1d9   : > { %v1991_v1 = vround.rtne.f32 %v686_v2  ;;  %v560_v3 = vpop.f32.mrb[3].mxu0  ;;  %v601_v4 = vpop.f32.mrb[3].mxu1  ;;  %v2214_v2 = vld [vmem:[#allocation7 + $0x330] ss:$8 sps:$4 sm:$0xff]   ;;  %v2220_v62 = vld [vmem:[#allocation7 + $0x340] ss:$8 sps:$4 sm:$0xff]  }
 0x1da   : > { %v1992_v5 = vround.rtne.f32 %v687_v61  ;;  %v1994_v6 = vround.rtne.f32 %v689_v63  ;;  %v2225_v61 = vld [vmem:[#allocation7 + $0x174] ss:$8 sps:$4 sm:$0xff]   ;;  %v2223_v63 = vld [vmem:[#allocation7 + $0x170] ss:$8 sps:$4 sm:$0xff]   ;;  %v2229_v4 = vld [vmem:[#allocation7 + $0x180] ss:$8 sps:$4 sm:$0xff]  }
 0x1db   : > { %v702_v7 = vmax.f32 %v1991_v1, -64.0  ;;  %v2228_v0 = vld [vmem:[#allocation7 + $0x354] ss:$8 sps:$4 sm:$0xff]   ;;  %v2231_v1 = vld [vmem:[#allocation7 + $0x184] ss:$8 sps:$4 sm:$0xff]  }
 0x1dc   : > { %v703_v8 = vmax.f32 %v1992_v5, -64.0  ;;  %v705_v9 = vmax.f32 %v1994_v6, -64.0  ;;  %v2226_v3 = vld [vmem:[#allocation7 + $0x350] ss:$8 sps:$4 sm:$0xff]   ;;  %v2234_v5 = vld [vmem:[#allocation7 + $0x364] ss:$8 sps:$4 sm:$0xff]  }
 0x1dd   : > { %v710_v10 = vmin.f32 %v702_v7, 191.0  ;;  %v2237_v6 = vld [vmem:[#allocation7 + $0x194] ss:$8 sps:$4 sm:$0xff]   ;;  %v2232_v7 = vld [vmem:[#allocation7 + $0x360] ss:$8 sps:$4 sm:$0xff]  }
 0x1de   : > { %v711_v13 = vmin.f32 %v703_v8, 191.0  ;;  %v713_v14 = vmin.f32 %v705_v9, 191.0  ;;  %v2235_v8 = vld [vmem:[#allocation7 + $0x190] ss:$8 sps:$4 sm:$0xff]   ;;  %v2240_v9 = vld [vmem:[#allocation7 + $0x374] ss:$8 sps:$4 sm:$0xff]  }
 0x1df   : > { %v718_v18 = vpack.c.bf16 %v710_v10, %v710_v10  ;;  %v2243_v10 = vld [vmem:[#allocation7 + $0x1a4] ss:$8 sps:$4 sm:$0xff]  }
 0x1e0   : > { %v719_v15 = vpack.c.bf16 %v711_v13, %v711_v13  ;;  %v721_v17 = vpack.c.bf16 %v713_v14, %v713_v14  ;;  %v637_v21 = vpop.f32.mrb[4].mxu0  ;;  %v2238_v13 = vld [vmem:[#allocation7 + $0x370] ss:$8 sps:$4 sm:$0xff]   ;;  %v2241_v14 = vld [vmem:[#allocation7 + $0x1a0] ss:$8 sps:$4 sm:$0xff]  }
 0x1e1   : > { %v678_v23 = vpop.f32.mrb[4].mxu1  ;;  %v690_v24 = vmul.f32 %v685_v55, %v637_v21  ;;  %v639_v25 = vpop.f32.mrb[5].mxu0  ;;  %v2252_v21 = vld [vmem:[#allocation7 + $0x394] ss:$8 sps:$4 sm:$0xff]  }
 0x1e2   : > { %1526 = vmatprep.mubr.bf16.mxu1 %v719_v15  ;;  %v2744_v26 = vmul.f32 %v685_v55, %v678_v23  ;;  %v680_v27 = vpop.f32.mrb[5].mxu1  ;;  %v691_v19 = vmul.f32 %v685_v55, %v639_v25  ;;  %v641_v28 = vpop.f32.mrb[6].mxu0  ;;  %v2246_v15 = vld [vmem:[#allocation7 + $0x384] ss:$8 sps:$4 sm:$0xff]   ;;  %v2250_v23 = vld [vmem:[#allocation7 + $0x390] ss:$8 sps:$4 sm:$0xff]  }
 0x1e3   : > { %1527 = vmatmul.mubr.bf16.vlgmr.msra.gmra.mrb[8].mxu1 %v718_v18  ;;  %v693_v20 = vmul.f32 %v685_v55, %v680_v27  ;;  %v682_v31 = vpop.f32.mrb[6].mxu1  ;;  %v1995_v32 = vround.rtne.f32 %v690_v24  ;;  %v642_v33 = vpop.f32.mrb[7].mxu0  ;;  %v2211_v55 = vld [vmem:[#allocation7 + $0x150] ss:$8 sps:$4 sm:$0xff]   ;;  %v2253_v24 = vld [vmem:[#allocation7 + $0x1c0] ss:$8 sps:$4 sm:$0xff]  }
 0x1e4   : > { %1536 = vmatpush1.bf16.msra.mxu1 %v2181_v16  ;;  %v683_v36 = vpop.f32.mrb[7].mxu1  ;;  %1567 = vmatprep.mubr.bf16.mxu1 %v721_v17  ;;  %v1996_v37 = vround.rtne.f32 %v691_v19  ;;  %v2249_v16 = vld [vmem:[#allocation7 + $0x1b4] ss:$8 sps:$4 sm:$0xff]   ;;  %v2244_v17 = vld [vmem:[#allocation7 + $0x380] ss:$8 sps:$4 sm:$0xff]   ;;  %v1993_v31 = vround.rtne.f32 %v2742_v59 }
 0x1e5   : > { %1537 = vmatprep.subr.bf16.mxu1 %v2189_v22  ;;  %v1998_v39 = vround.rtne.f32 %v693_v20  ;;  %v706_v40 = vmax.f32 %v1995_v32, -64.0  ;;  %v2247_v18 = vld [vmem:[#allocation7 + $0x1b0] ss:$8 sps:$4 sm:$0xff]   ;;  %v2255_v22 = vld [vmem:[#allocation7 + $0x1c4] ss:$8 sps:$4 sm:$0xff]  }
 0x1e6   : > { %v707_v41 = vmax.f32 %v1996_v37, -64.0  ;;  %v2258_v25 = vld [vmem:[#allocation7 + $0x3a4] ss:$8 sps:$4 sm:$0xff]   ;;  %v2261_v27 = vld [vmem:[#allocation7 + $0x1d4] ss:$8 sps:$4 sm:$0xff]   ;;  %v704_v37 = vmax.f32 %v1993_v31, -64.0 }
 0x1e7   : > { %v709_v42 = vmax.f32 %v1998_v39, -64.0  ;;  %v714_v11 = vmin.f32 %v706_v40, 191.0  ;;  %v2256_v19 = vld [vmem:[#allocation7 + $0x3a0] ss:$8 sps:$4 sm:$0xff]   ;;  %v2259_v28 = vld [vmem:[#allocation7 + $0x1d0] ss:$8 sps:$4 sm:$0xff]  }
 0x1e8   : > { %1538 = vmatpush1.bf16.msra.mxu1 %v2187_v34  ;;  %v715_v43 = vmin.f32 %v707_v41, 191.0  ;;  %v2264_v20 = vld [vmem:[#allocation7 + $0x3b4] ss:$8 sps:$4 sm:$0xff]   ;;  %v2267_v32 = vld [vmem:[#allocation7 + $0x1e4] ss:$8 sps:$4 sm:$0xff]  }
 0x1e9   : > { %1539 = vmatprep.subr.bf16.mxu1 %v2195_v38  ;;  %v717_v30 = vmin.f32 %v709_v42, 191.0  ;;  %v722_v47 = vpack.c.bf16 %v714_v11, %v714_v11  ;;  %v2262_v33 = vld [vmem:[#allocation7 + $0x3b0] ss:$8 sps:$4 sm:$0xff]   ;;  %v2265_v34 = vld [vmem:[#allocation7 + $0x1e0] ss:$8 sps:$4 sm:$0xff]   ;;  %v712_v42 = vmin.f32 %v704_v37, 191.0  ;;  %v1997_v11 = vround.rtne.f32 %v2744_v26 }
 0x1ea   : > { %v723_v35 = vpack.c.bf16 %v715_v43, %v715_v43  ;;  %v2270_v36 = vld [vmem:[#allocation7 + $0x3c4] ss:$8 sps:$4 sm:$0xff]   ;;  %v2273_v38 = vld [vmem:[#allocation7 + $0x1f4] ss:$8 sps:$4 sm:$0xff]   ;;  %v2268_v39 = vld [vmem:[#allocation7 + $0x3c0] ss:$8 sps:$4 sm:$0xff]  }
 0x1eb   : > { %v725_v46 = vpack.c.bf16 %v717_v30, %v717_v30  ;;  %v2271_v40 = vld [vmem:[#allocation7 + $0x1f0] ss:$8 sps:$4 sm:$0xff]   ;;  %v2276_v41 = vld [vmem:[#allocation7 + $0x3d4] ss:$8 sps:$4 sm:$0xff]   ;;  %v720_v43 = vpack.c.bf16 %v712_v42, %v712_v42  ;;  %v708_v30 = vmax.f32 %v1997_v11, -64.0 }
 0x1ec   : > { %1540 = vmatpush1.bf16.msra.mxu1 %v2193_v29  ;;  %1608 = vmatprep.mubr.bf16.mxu0 %v723_v35  ;;  %v2274_v59 = vld [vmem:[#allocation7 + $0x3d0] ss:$8 sps:$4 sm:$0xff]   ;;  %v2279_v29 = vld [vmem:[#allocation7 + $0x3e4] ss:$8 sps:$4 sm:$0xff]   ;;  %v2282_v35 = vld [vmem:[#allocation7 + $0x3f4] ss:$8 sps:$4 sm:$0xff]  }
 0x1ed   : > { %1541 = vmatprep.subr.bf16.mxu1 %v2201_v12  ;;  %1609 = vmatmul.mubr.bf16.vlgmr.msra.gmra.mrb[8].mxu0 %v722_v47  ;;  %v2277_v12 = vld [vmem:[#allocation7 + $0x3e0] ss:$8 sps:$4 sm:$0xff]  }
 0x1ee   : > { %1618 = vmatpush1.bf16.msra.mxu0 %v2196_v45  ;;  %1649 = vmatprep.mubr.bf16.mxu0 %v725_v46  ;;  %v2280_v45 = vld [vmem:[#allocation7 + $0x3f0] ss:$8 sps:$4 sm:$0xff]   ;;  %v716_v46 = vmin.f32 %v708_v30, 191.0 }
 0x1ef   : > { %1619 = vmatprep.subr.bf16.mxu0 %v2204_v48 }
 0x1f0   : > { %1542 = vmatpush1.bf16.msra.mxu1 %v2199_v44  ;;  %v724_v47 = vpack.c.bf16 %v716_v46, %v716_v46 }
 0x1f1   : > { %1543 = vmatprep.subr.bf16.mxu1 %v2207_v49 }
 0x1f2   : > { %1620 = vmatpush1.bf16.msra.mxu0 %v2202_v50 }
 0x1f3   : > { %1621 = vmatprep.subr.bf16.mxu0 %v2210_v52 }
 0x1f4   : > { %1544 = vmatpush1.bf16.msra.mxu1 %v2205_v51 }
 0x1f5   : > { %1545 = vmatprep.subr.bf16.mxu1 %v2213_v53 }
 0x1f6   : > { %1622 = vmatpush1.bf16.msra.mxu0 %v2208_v54 }
 0x1f7   : > { %1623 = vmatprep.subr.bf16.mxu0 %v2216_v56 }
 0x1f8   : > { %1546 = vmatpush1.bf16.msra.mxu1 %v2211_v55 }
 0x1f9   : > { %1547 = vmatprep.subr.bf16.mxu1 %v2219_v57 }
 0x1fa   : > { %1624 = vmatpush1.bf16.msra.mxu0 %v2214_v2 }
 0x1fb   : > { %1625 = vmatprep.subr.bf16.mxu0 %v2222_v60 }
 0x1fc   : > { %1548 = vmatpush1.bf16.msra.mxu1 %v2217_v58 }
 0x1fd   : > { %1549 = vmatprep.subr.bf16.mxu1 %v2225_v61  ;;  %v1666_v61 = vstv %s1809_s29 }
 0x1fe   : > { %1626 = vmatpush1.bf16.msra.mxu0 %v2220_v62 }
 0x1ff   : > { %1627 = vmatprep.subr.bf16.mxu0 %v2228_v0 }
 0x200   : > { %1550 = vmatpush1.bf16.msra.mxu1 %v2223_v63 }
 0x201   : > { %1551 = vmatprep.subr.bf16.mxu1 %v2231_v1 }
 0x202   : > { %1628 = vmatpush1.bf16.msra.mxu0 %v2226_v3 }
 0x203   : > { %1629 = vmatprep.subr.bf16.mxu0 %v2234_v5 }
 0x204   : > { %1552 = vmatpush1.bf16.msra.mxu1 %v2229_v4 }
 0x205   : > { %1553 = vmatprep.subr.bf16.mxu1 %v2237_v6 }
 0x206   : > { %1630 = vmatpush1.bf16.msra.mxu0 %v2232_v7 }
 0x207   : > { %1631 = vmatprep.subr.bf16.mxu0 %v2240_v9 }
 0x208   : > { %1554 = vmatpush1.bf16.msra.mxu1 %v2235_v8 }
 0x209   : > { %1555 = vmatprep.subr.bf16.mxu1 %v2243_v10 }
 0x20a   : > { %1632 = vmatpush1.bf16.msra.mxu0 %v2238_v13 }
 0x20b   : > { %1633 = vmatprep.subr.bf16.mxu0 %v2246_v15 }
 0x20c   : > { %1556 = vmatpush1.bf16.msra.mxu1 %v2241_v14 }
 0x20d   : > { %1557 = vmatprep.subr.bf16.mxu1 %v2249_v16 }
 0x20e   : > { %1634 = vmatpush1.bf16.msra.mxu0 %v2244_v17 }
 0x20f   : > { %1635 = vmatprep.subr.bf16.mxu0 %v2252_v21 }
 0x210   : > { %1558 = vmatpush1.bf16.msra.mxu1 %v2247_v18 }
 0x211   : > { %1559 = vmatprep.subr.bf16.mxu1 %v2255_v22 }
 0x212   : > { %1636 = vmatpush1.bf16.msra.mxu0 %v2250_v23 }
 0x213   : > { %1637 = vmatprep.subr.bf16.mxu0 %v2258_v25 }
 0x214   : > { %1560 = vmatpush1.bf16.msra.mxu1 %v2253_v24 }
 0x215   : > { %1561 = vmatprep.subr.bf16.mxu1 %v2261_v27 }
 0x216   : > { %1638 = vmatpush1.bf16.msra.mxu0 %v2256_v19 }
 0x217   : > { %1639 = vmatprep.subr.bf16.mxu0 %v2264_v20 }
 0x218   : > { %1562 = vmatpush1.bf16.msra.mxu1 %v2259_v28 }
 0x219   : > { %1563 = vmatprep.subr.bf16.mxu1 %v2267_v32 }
 0x21a   : > { %1640 = vmatpush1.bf16.msra.mxu0 %v2262_v33 }
 0x21b   : > { %1641 = vmatprep.subr.bf16.mxu0 %v2270_v36 }
 0x21c   : > { %1564 = vmatpush1.bf16.msra.mxu1 %v2265_v34 }
 0x21d   : > { %1565 = vmatprep.subr.bf16.mxu1 %v2273_v38 }
 0x21e   : > { %1642 = vmatpush1.bf16.msra.mxu0 %v2268_v39 }
 0x21f   : > { %1643 = vmatprep.subr.bf16.mxu0 %v2276_v41 }
 0x220   : > { %1566 = vmatpush1.bf16.msra.mxu1 %v2271_v40 }
 0x222   : > { %1644 = vmatpush1.bf16.msra.mxu0 %v2274_v59 }
 0x223   : > { %1568 = vmatmul.mubr.bf16.vlgmr.msra.gmra.mrb[8].mxu1 %v720_v43  ;;  %1645 = vmatprep.subr.bf16.mxu0 %v2279_v29 }
 0x226   : > { %1646 = vmatpush1.bf16.msra.mxu0 %v2277_v12 }
 0x227   : > { %1647 = vmatprep.subr.bf16.mxu0 %v2282_v35 }
 0x22a   : > { %1648 = vmatpush1.bf16.msra.mxu0 %v2280_v45 }
 0x22d   : > { %1650 = vmatmul.mubr.bf16.vlgmr.msra.gmra.mrb[8].mxu0 %v724_v47 }
 0x2f6   : > { %v1569_v44 = vpop.f32.mrb[8].mxu1 }
 0x2f7   : > { %v1571_v26 = vpop.f32.mrb[9].mxu1 }
 0x2f8   : > { %v1573_v48 = vpop.f32.mrb[10].mxu1 }
 0x2f9   : > { %v1574_v49 = vpop.f32.mrb[11].mxu1 }
 0x300   : > { %v1651_v50 = vpop.f32.mrb[8].mxu0 }
 0x301   : > { %v1949_v51 = vadd.f32 %v1651_v50, %v1569_v44  ;;  %v1653_v52 = vpop.f32.mrb[9].mxu0 }
 0x302   : > { %v1950_v53 = vadd.f32 %v1653_v52, %v1571_v26  ;;  %v1655_v54 = vpop.f32.mrb[10].mxu0 }
 0x303   : > { %v1658_v55 = vmul.f32 0.25, %v1949_v51  ;;  %v1656_v56 = vpop.f32.mrb[11].mxu0 }
 0x304   : > { %v1659_v57 = vmul.f32 0.25, %v1950_v53 }
 0x305   : > { %v1999_v2 = vround.rtne.f32 %v1658_v55 }
 0x306   : > { %v2000_v58 = vround.rtne.f32 %v1659_v57 }
 0x307   : > { %v1662_v60 = vmax.f32 %v1999_v2, -64.0 }
 0x308   : > { %v1663_v62 = vmax.f32 %v2000_v58, -64.0 }
 0x309   : > { %v1664_v63 = vmin.f32 %v1662_v60, 191.0 }
 0x30a   : > { %v1665_v0 = vmin.f32 %v1663_v62, 191.0 }
 0x30b   : > { %v1667_v1 = vmul.f32 %v1666_v61, %v1664_v63 }
 0x30c   : > { %v1668_v3 = vmul.f32 %v1666_v61, %v1665_v0 }
 0x30d   : > { %1669 = vst [vmem:[%s316_s14] sm:$0xff] %v1667_v1 }
 0x30e   : > { %1670 = vst [vmem:[%s316_s14 + $0x8] sm:$0xff] %v1668_v3 }
 0x30f   : > { %2369 = shalt.err (!%p2366_p5)
}
 0x310   : > { %s2370_s19 = scalar_lea.hbm %s2753_s30, 256  ;;  %s2374_s7 = scalar_lea.hbm %s2808_s6, 512 }
 0x311   : > { %p2371_p9 = scmp.ne.s32.totalorder %s2753_s30, %s2370_s19  ;;  %p2375_p10 = scmp.lt.u32.totalorder %s2753_s30, %s2808_s6 }
 0x312   : > { %p2376_p12 = scmp.lt.u32.totalorder %s2374_s7, %s2370_s19  ;;  %p2378_p3 = scmp.lt.u32.totalorder %s2370_s19, %s2753_s30 }
 0x313   : > { %p2372_p13 = pnand %p2371_p9, %p2832_p8 }
 0x314   : > { %p2377_p2 = por %p2376_p12, %p2375_p10 }
 0x315   : > { %p2373_p11 = pneg %p2372_p13 }
 0x316   : > { %p2379_p0 = por %p2378_p3, %p2377_p2 }
 0x318   : > { %p2380_p1 = pnand %p2379_p0, %p2373_p11 }
 0x31a   : > { %2383 = shalt.err (!%p2380_p1)
}
 0x31b   : > { %2011 = dma.vmem_to_hbm [thread:$0]  (%p2832_p8), %s2755_s20, 256, %s2753_s30, %s1672_s8  }
 0x31c PF: > { %s2833_s18 = sld [smem:[#allocation14_spill]]  ;;  %s1700_s14 = sand.u32 1, %s2426_s21  }
 0x31d   : > { %p2834_p6 = scmp.ne.s32.totalorder %s2822_s10, 0  ;;  %s1701_s27 = scalar_lea.sflag [#allocation4], %s1700_s14 }
 0x322   : > { %p2835_p7 = scmp.ge.s32.totalorder %s2833_s18, 2 }
 0x324   : > { %p2025_p4 = pnand %p2835_p7, %p2834_p6 }
 0x326   : > { %2421 = dma.done.wait (!%p2025_p4), %s1701_s27, 256  }
 0x327   : > { %2423 = vsyncadd (!%p2025_p4), %s1701_s27, 4294967040  ;;  %s24_s26 = sadd.s32 1, %s2833_s18   ;;  %s2836_s21 = smov %s2430_s22 }
 0x328   : > { %p21_p5 = scmp.ge.s32.totalorder %s24_s26, 4   ;;  %s2837_s22 = smov %s2434_s23 }
 0x329   : > { %s2838_s23 = smov %s2662_s16  ;;  %s2839_s24 = smov %s2442_s25 }
 0x32a   : > { %s2840_s25 = smov %s2842_s12  ;;  %23 = sbr.rel (!%p21_p5) target bundleno = 10 (0xa), region = 98 }
 0x331   :  { %1706 = vsyncpa [#allocation3], 1 }
 0x332   :  { %1708 = vsyncpa [#allocation3 + $0x1], 1 }
 0x333   :  { %1709 = vsyncpa [#allocation8], 1 }
 0x334   :  { %1710 = vsyncpa [#allocation4], 1 }
 0x335   :  { %1712 = vsyncpa [#allocation4 + $0x1], 1 }
 0x336   :  { %1713 = vsyncpa [#allocation5], 1 }
 0x337   :  { %1715 = vsyncpa [#allocation5 + $0x1], 1 }

</bundles_post_ra>
